<compile_context>
chip_gen: v6e
topology: v6e:2x2x1
jax: 0.10.0
libtpu: 0.0.40
codegen_flags: <defaults>
</compile_context>

<pallas_src>
import functools

import jax
import jax.numpy as jnp
from jax import lax
from jax.experimental import pallas as pl
from jax.experimental.pallas import tpu as pltpu


def _dice_partial_kernel(x_ref, t_ref, out_ref, acc_xt_ref, acc_s_ref, *,
                         rows_total, block_rows, blocks_per_shard):
    s = pl.program_id(0)          # shard (parallel axis; one per TC on v7x)
    j = pl.program_id(1)          # block within shard (reduction axis)

    @pl.when(j == 0)
    def _init():
        acc_xt_ref[...] = jnp.zeros_like(acc_xt_ref)
        acc_s_ref[...] = jnp.zeros_like(acc_s_ref)

    # Logical (un-clamped) global block index -> starting row of this tile.
    logical_block = s * blocks_per_shard + j
    row_start = logical_block * block_rows

    x = x_ref[...].astype(jnp.float32)
    t = t_ref[...].astype(jnp.float32)

    def accumulate(xv, tv):
        # (block_rows,128) -> (block_rows//8, 8, 128): layout-preserving split
        # of the second-minor dim; sum over the leading axis is pure vreg adds
        # (VPU), keeping the accumulator lane/sublane-resident.
        acc_xt_ref[...] += (xv * tv).reshape(-1, 8, 128).sum(axis=0)
        acc_s_ref[...] += (xv + tv).reshape(-1, 8, 128).sum(axis=0)

    needs_mask = row_start + block_rows > rows_total

    @pl.when(jnp.logical_not(needs_mask))
    def _fast():
        accumulate(x, t)

    @pl.when(needs_mask)
    def _masked():
        # Only the boundary / duplicated-OOB block pays for the mask.
        row_ids = lax.broadcasted_iota(jnp.int32, (block_rows, 128), 0)
        valid = row_ids < (rows_total - row_start)
        accumulate(jnp.where(valid, x, 0.0), jnp.where(valid, t, 0.0))

    @pl.when(j == pl.num_programs(1) - 1)
    def _finalize():
        out_ref[0, 0] = acc_xt_ref[...]   # partial sum(x * t)
        out_ref[0, 1] = acc_s_ref[...]    # partial sum(x + t)


def dice_loss(inputs, targets, smooth=1.0, *, block_rows=2048, num_shards=2):
    """Pallas TPU implementation of DiceLoss.forward.

    inputs/targets: any-shape arrays (e.g. NCHW); flattened row-major, exactly
    like `.reshape(-1)` in the PyTorch module.  Returns a float32 scalar.
    """
    lanes = 128
    x = jnp.ravel(inputs)
    t = jnp.ravel(targets)
    n = x.shape[0]

    if n % lanes != 0:
        # TODO(synk): only hit when numel isn't a multiple of 128; this path
        # costs one extra copy (pad with sum-neutral zeros).
        pad = lanes - (n % lanes)
        x = jnp.pad(x, (0, pad))
        t = jnp.pad(t, (0, pad))

    rows = x.shape[0] // lanes
    x = x.reshape(rows, lanes)    # metadata-only reshape in the common case
    t = t.reshape(rows, lanes)

    # Sublane multiple for the native dtypes (f32: 8, bf16: 16, int8/fp8: 32).
    def _sub_mult(dtype):
        return max(8, 32 // jnp.dtype(dtype).itemsize)

    sub = max(_sub_mult(x.dtype), _sub_mult(t.dtype))
    block_rows = max(sub, (int(block_rows) // sub) * sub)
    rows_rounded = ((rows + sub - 1) // sub) * sub
    block_rows = min(block_rows, rows_rounded)      # don't over-allocate VMEM

    num_blocks = -(-rows // block_rows)             # cdiv
    num_shards = max(1, int(num_shards))
    blocks_per_shard = -(-num_blocks // num_shards)  # cdiv

    def in_index(s, j):
        # Clamp so a shard's trailing logical block never indexes past the
        # array; the kernel masks it out based on the *logical* index.
        return (jnp.minimum(s * blocks_per_shard + j, num_blocks - 1), 0)

    kernel = functools.partial(
        _dice_partial_kernel,
        rows_total=rows,
        block_rows=block_rows,
        blocks_per_shard=blocks_per_shard,
    )

    partials = pl.pallas_call(
        kernel,
        out_shape=jax.ShapeDtypeStruct((num_shards, 2, 8, 128), jnp.float32),
        grid_spec=pltpu.PrefetchScalarGridSpec(
            num_scalar_prefetch=0,
            grid=(num_shards, blocks_per_shard),
            in_specs=[
                pl.BlockSpec((block_rows, lanes), in_index),
                pl.BlockSpec((block_rows, lanes), in_index),
            ],
            out_specs=pl.BlockSpec((1, 2, 8, 128), lambda s, j: (s, 0, 0, 0)),
            scratch_shapes=[
                pltpu.VMEM((8, 128), jnp.float32),   # acc: sum(x * t)
                pltpu.VMEM((8, 128), jnp.float32),   # acc: sum(x + t)
            ],
        ),
        compiler_params=pltpu.CompilerParams(
            dimension_semantics=("parallel", "arbitrary"),
        ),
    )(x, t)

    # Tiny epilogue: combine per-shard / per-lane partials and form the loss.
    intersection = jnp.sum(partials[:, 0])
    sum_x_plus_t = jnp.sum(partials[:, 1])
    smooth = jnp.float32(smooth)
    dice = (2.0 * intersection + smooth) / (sum_x_plus_t + smooth)
    return jnp.float32(1.0) - dice


def dice_loss_ref(inputs, targets, smooth=1.0):
    x = jnp.ravel(inputs).astype(jnp.float32)
    t = jnp.ravel(targets).astype(jnp.float32)
    intersection = jnp.sum(x * t)
    dice = (2.0 * intersection + smooth) / (jnp.sum(x) + jnp.sum(t) + smooth)
    return 1.0 - dice


if __name__ == "__main__":
    key = jax.random.PRNGKey(0)
    k1, k2 = jax.random.split(key)
    # Small NCHW shapes consistent with a segmentation-style DiceLoss.
    x = jax.nn.sigmoid(jax.random.normal(k1, (2, 4, 16, 16), dtype=jnp.float32))
    tgt = (jax.random.uniform(k2, (2, 4, 16, 16)) > 0.5).astype(jnp.float32)

    out = dice_loss(x, tgt, smooth=1.0)
    out = jax.block_until_ready(out)

    ref = dice_loss_ref(x, tgt, smooth=1.0)
    assert jnp.allclose(out, ref, atol=1e-5, rtol=1e-5), (out, ref)
    print("KERNEL_OK")
</pallas_src>

<mosaic_0001>
module attributes {stable_mosaic.version = 11 : i64} {
  func.func @_dice_partial_kernel(%arg0: i32, %arg1: i32, %arg2: memref<16x128xf32, #tpu.memory_space<vmem>>, %arg3: memref<16x128xf32, #tpu.memory_space<vmem>>, %arg4: memref<1x2x8x128xf32, #tpu.memory_space<vmem>>, %arg5: memref<8x128xf32, #tpu.memory_space<vmem>>, %arg6: memref<8x128xf32, #tpu.memory_space<vmem>>) attributes {dimension_semantics = [#tpu.dimension_semantics<parallel>, #tpu.dimension_semantics<arbitrary>], iteration_bounds = array<i64: 2, 1>, scalar_prefetch = 0 : i64, scratch_operands = 2 : i64, tpu.core_type = #tpu.core_type<tc>, window_params = [{transform_indices = @transform_0, window_bounds = array<i64: 16, 128>}, {transform_indices = @transform_1, window_bounds = array<i64: 16, 128>}, {transform_indices = @transform_2, window_bounds = array<i64: 1, 2, 8, 128>}]} {
    %c0_i32 = arith.constant 0 : i32
    %0 = arith.cmpi eq, %arg1, %c0_i32 : i32
    %1 = arith.extui %0 : i1 to i32
    %c0_i32_0 = arith.constant 0 : i32
    %2 = arith.cmpi ne, %1, %c0_i32_0 : i32
    scf.if %2 {
      %cst = arith.constant 0.000000e+00 : f32
      %18 = vector.broadcast %cst : f32 to vector<8x128xf32>
      %c0_10 = arith.constant 0 : index
      %c0_11 = arith.constant 0 : index
      %19 = vector.load %arg5[%c0_10, %c0_11] : memref<8x128xf32, #tpu.memory_space<vmem>>, vector<8x128xf32>
      tpu.vector_store %arg5[%c0_10, %c0_11], %18 {strides = array<i32>} : memref<8x128xf32, #tpu.memory_space<vmem>>, vector<8x128xf32>,
      %cst_12 = arith.constant 0.000000e+00 : f32
      %20 = vector.broadcast %cst_12 : f32 to vector<8x128xf32>
      %c0_13 = arith.constant 0 : index
      %c0_14 = arith.constant 0 : index
      %21 = vector.load %arg6[%c0_13, %c0_14] : memref<8x128xf32, #tpu.memory_space<vmem>>, vector<8x128xf32>
      tpu.vector_store %arg6[%c0_13, %c0_14], %20 {strides = array<i32>} : memref<8x128xf32, #tpu.memory_space<vmem>>, vector<8x128xf32>,
    } else {
    }
    %c1_i32 = arith.constant 1 : i32
    %3 = arith.muli %arg0, %c1_i32 : i32
    %4 = arith.addi %3, %arg1 : i32
    %c16_i32 = arith.constant 16 : i32
    %5 = arith.muli %4, %c16_i32 : i32
    %c0 = arith.constant 0 : index
    %c0_1 = arith.constant 0 : index
    %6 = vector.load %arg2[%c0, %c0_1] : memref<16x128xf32, #tpu.memory_space<vmem>>, vector<16x128xf32>
    %c0_2 = arith.constant 0 : index
    %c0_3 = arith.constant 0 : index
    %7 = vector.load %arg3[%c0_2, %c0_3] : memref<16x128xf32, #tpu.memory_space<vmem>>, vector<16x128xf32>
    %c16_i32_4 = arith.constant 16 : i32
    %8 = arith.addi %5, %c16_i32_4 : i32
    %c16_i32_5 = arith.constant 16 : i32
    %9 = arith.cmpi sgt, %8, %c16_i32_5 : i32
    %true = arith.constant true
    %10 = arith.xori %9, %true : i1
    %11 = arith.extui %10 : i1 to i32
    %c0_i32_6 = arith.constant 0 : i32
    %12 = arith.cmpi ne, %11, %c0_i32_6 : i32
    scf.if %12 {
      %c0_10 = arith.constant 0 : index
      %c0_11 = arith.constant 0 : index
      %18 = vector.load %arg5[%c0_10, %c0_11] : memref<8x128xf32, #tpu.memory_space<vmem>>, vector<8x128xf32>
      %19 = arith.mulf %6, %7 : vector<16x128xf32>
      %20 = vector.shape_cast %19 : vector<16x128xf32> to vector<2x8x128xf32>
      %cst = arith.constant dense<0.000000e+00> : vector<8x128xf32>
      %21 = vector.multi_reduction <add>, %20, %cst [0] : vector<2x8x128xf32> to vector<8x128xf32>
      %22 = arith.addf %18, %21 : vector<8x128xf32>
      %c0_12 = arith.constant 0 : index
      %c0_13 = arith.constant 0 : index
      %23 = vector.load %arg5[%c0_12, %c0_13] : memref<8x128xf32, #tpu.memory_space<vmem>>, vector<8x128xf32>
      tpu.vector_store %arg5[%c0_12, %c0_13], %22 {strides = array<i32>} : memref<8x128xf32, #tpu.memory_space<vmem>>, vector<8x128xf32>,
      %c0_14 = arith.constant 0 : index
      %c0_15 = arith.constant 0 : index
      %24 = vector.load %arg6[%c0_14, %c0_15] : memref<8x128xf32, #tpu.memory_space<vmem>>, vector<8x128xf32>
      %25 = arith.addf %6, %7 : vector<16x128xf32>
      %26 = vector.shape_cast %25 : vector<16x128xf32> to vector<2x8x128xf32>
      %cst_16 = arith.constant dense<0.000000e+00> : vector<8x128xf32>
      %27 = vector.multi_reduction <add>, %26, %cst_16 [0] : vector<2x8x128xf32> to vector<8x128xf32>
      %28 = arith.addf %24, %27 : vector<8x128xf32>
      %c0_17 = arith.constant 0 : index
      %c0_18 = arith.constant 0 : index
      %29 = vector.load %arg6[%c0_17, %c0_18] : memref<8x128xf32, #tpu.memory_space<vmem>>, vector<8x128xf32>
      tpu.vector_store %arg6[%c0_17, %c0_18], %28 {strides = array<i32>} : memref<8x128xf32, #tpu.memory_space<vmem>>, vector<8x128xf32>,
    } else {
    }
    %13 = arith.extui %9 : i1 to i32
    %c0_i32_7 = arith.constant 0 : i32
    %14 = arith.cmpi ne, %13, %c0_i32_7 : i32
    scf.if %14 {
      %18 = tpu.iota {dimensions = array<i32: 0>} : vector<16x128xi32>
      %c16_i32_10 = arith.constant 16 : i32
      %19 = arith.subi %c16_i32_10, %5 : i32
      %20 = vector.broadcast %19 : i32 to vector<16x128xi32>
      %21 = arith.cmpi slt, %18, %20 : vector<16x128xi32>
      %cst = arith.constant 0.000000e+00 : f32
      %22 = vector.broadcast %cst : f32 to vector<16x128xf32>
      %23 = arith.select %21, %6, %22 : vector<16x128xi1>, vector<16x128xf32>
      %cst_11 = arith.constant 0.000000e+00 : f32
      %24 = vector.broadcast %cst_11 : f32 to vector<16x128xf32>
      %25 = arith.select %21, %7, %24 : vector<16x128xi1>, vector<16x128xf32>
      %c0_12 = arith.constant 0 : index
      %c0_13 = arith.constant 0 : index
      %26 = vector.load %arg5[%c0_12, %c0_13] : memref<8x128xf32, #tpu.memory_space<vmem>>, vector<8x128xf32>
      %27 = arith.mulf %23, %25 : vector<16x128xf32>
      %28 = vector.shape_cast %27 : vector<16x128xf32> to vector<2x8x128xf32>
      %cst_14 = arith.constant dense<0.000000e+00> : vector<8x128xf32>
      %29 = vector.multi_reduction <add>, %28, %cst_14 [0] : vector<2x8x128xf32> to vector<8x128xf32>
      %30 = arith.addf %26, %29 : vector<8x128xf32>
      %c0_15 = arith.constant 0 : index
      %c0_16 = arith.constant 0 : index
      %31 = vector.load %arg5[%c0_15, %c0_16] : memref<8x128xf32, #tpu.memory_space<vmem>>, vector<8x128xf32>
      tpu.vector_store %arg5[%c0_15, %c0_16], %30 {strides = array<i32>} : memref<8x128xf32, #tpu.memory_space<vmem>>, vector<8x128xf32>,
      %c0_17 = arith.constant 0 : index
      %c0_18 = arith.constant 0 : index
      %32 = vector.load %arg6[%c0_17, %c0_18] : memref<8x128xf32, #tpu.memory_space<vmem>>, vector<8x128xf32>
      %33 = arith.addf %23, %25 : vector<16x128xf32>
      %34 = vector.shape_cast %33 : vector<16x128xf32> to vector<2x8x128xf32>
      %cst_19 = arith.constant dense<0.000000e+00> : vector<8x128xf32>
      %35 = vector.multi_reduction <add>, %34, %cst_19 [0] : vector<2x8x128xf32> to vector<8x128xf32>
      %36 = arith.addf %32, %35 : vector<8x128xf32>
      %c0_20 = arith.constant 0 : index
      %c0_21 = arith.constant 0 : index
      %37 = vector.load %arg6[%c0_20, %c0_21] : memref<8x128xf32, #tpu.memory_space<vmem>>, vector<8x128xf32>
      tpu.vector_store %arg6[%c0_20, %c0_21], %36 {strides = array<i32>} : memref<8x128xf32, #tpu.memory_space<vmem>>, vector<8x128xf32>,
    } else {
    }
    %c0_i32_8 = arith.constant 0 : i32
    %15 = arith.cmpi eq, %arg1, %c0_i32_8 : i32
    %16 = arith.extui %15 : i1 to i32
    %c0_i32_9 = arith.constant 0 : i32
    %17 = arith.cmpi ne, %16, %c0_i32_9 : i32
    scf.if %17 {
      %c0_10 = arith.constant 0 : index
      %c0_11 = arith.constant 0 : index
      %18 = vector.load %arg5[%c0_10, %c0_11] : memref<8x128xf32, #tpu.memory_space<vmem>>, vector<8x128xf32>
      %c0_12 = arith.constant 0 : index
      %c0_13 = arith.constant 0 : index
      %c0_14 = arith.constant 0 : index
      %c0_15 = arith.constant 0 : index
      %19 = vector.load %arg4[%c0_12, %c0_13, %c0_14, %c0_15] : memref<1x2x8x128xf32, #tpu.memory_space<vmem>>, vector<1x1x8x128xf32>
      %20 = vector.shape_cast %19 : vector<1x1x8x128xf32> to vector<8x128xf32>
      %21 = vector.shape_cast %18 : vector<8x128xf32> to vector<1x1x8x128xf32>
      tpu.vector_store %arg4[%c0_12, %c0_13, %c0_14, %c0_15], %21 {strides = array<i32>} : memref<1x2x8x128xf32, #tpu.memory_space<vmem>>, vector<1x1x8x128xf32>,
      %c0_16 = arith.constant 0 : index
      %c0_17 = arith.constant 0 : index
      %22 = vector.load %arg6[%c0_16, %c0_17] : memref<8x128xf32, #tpu.memory_space<vmem>>, vector<8x128xf32>
      %c0_18 = arith.constant 0 : index
      %c1 = arith.constant 1 : index
      %c0_19 = arith.constant 0 : index
      %c0_20 = arith.constant 0 : index
      %23 = vector.load %arg4[%c0_18, %c1, %c0_19, %c0_20] : memref<1x2x8x128xf32, #tpu.memory_space<vmem>>, vector<1x1x8x128xf32>
      %24 = vector.shape_cast %23 : vector<1x1x8x128xf32> to vector<8x128xf32>
      %25 = vector.shape_cast %22 : vector<8x128xf32> to vector<1x1x8x128xf32>
      tpu.vector_store %arg4[%c0_18, %c1, %c0_19, %c0_20], %25 {strides = array<i32>} : memref<1x2x8x128xf32, #tpu.memory_space<vmem>>, vector<1x1x8x128xf32>,
    } else {
    }
    return
  }
  func.func @transform_0(%arg0: i32, %arg1: i32) -> (i32, i32) {
    %c1_i32 = arith.constant 1 : i32
    %0 = arith.muli %arg0, %c1_i32 : i32
    %1 = arith.addi %0, %arg1 : i32
    %c0_i32 = arith.constant 0 : i32
    %2 = arith.minsi %1, %c0_i32 : i32
    %c0_i32_0 = arith.constant 0 : i32
    %c0_i32_1 = arith.constant 0 : i32
    return %2, %c0_i32_0 : i32, i32
  }
  func.func @transform_1(%arg0: i32, %arg1: i32) -> (i32, i32) {
    %c1_i32 = arith.constant 1 : i32
    %0 = arith.muli %arg0, %c1_i32 : i32
    %1 = arith.addi %0, %arg1 : i32
    %c0_i32 = arith.constant 0 : i32
    %2 = arith.minsi %1, %c0_i32 : i32
    %c0_i32_0 = arith.constant 0 : i32
    %c0_i32_1 = arith.constant 0 : i32
    return %2, %c0_i32_0 : i32, i32
  }
  func.func @transform_2(%arg0: i32, %arg1: i32) -> (i32, i32, i32, i32) {
    %c0_i32 = arith.constant 0 : i32
    %c0_i32_0 = arith.constant 0 : i32
    %c0_i32_1 = arith.constant 0 : i32
    %c0_i32_2 = arith.constant 0 : i32
    return %arg0, %c0_i32, %c0_i32_0, %c0_i32_1 : i32, i32, i32, i32
  }
}

</mosaic_0001>

<bundles_post_ra>
// kernel: tpu_custom_call.1
= control target key start
LH: loop header
LB: loop body
LE: loop exit
PB: predicated region body
PF: predicated region fallthrough
CT: control target
= control target key end

     0   :  { %7 = vsyncpa [#allocation5], 0  ;;  %s933_s0 = inlined_call_operand.hbm [shape: f32[16,128], index: 0, kind: input, shape index: {}]   ;;  %s934_s1 = inlined_call_operand.hbm [shape: f32[16,128], index: 1, kind: input, shape index: {}]   ;;  %s935_s2 = inlined_call_operand.hbm [shape: f32[2,2,8,128], index: 2, kind: output, shape index: {}]  }
   0x1   :  { %9 = vsyncpa [#allocation5 + $0x1], 0 }
   0x2   :  { %10 = vsyncpa [#allocation8], 0 }
   0x3   :  { %12 = vsyncpa [#allocation8 + $0x1], 0 }
   0x4   :  { %13 = vsyncpa [#allocation6], 0 }
   0x5   :  { %15 = vsyncpa [#allocation6 + $0x1], 0  ;;  %s730_s9 = smov 0   ;;  %s732_s10 = smov 0  }
   0x6   :  { %s734_s11 = smov 0   ;;  %s736_s12 = smov 0  }
   0x7   :  { %s738_s13 = smov 0   ;;  %s740_s14 = smov 0  }
   0x8   :  { %s742_s15 = smov 0   ;;  %s744_s16 = smov 0  }
   0x9 LB: > { %s422_s17 = sadd.s32 4294967295, %s705_s16   ;;  %s423_s18 = sadd.s32 4294967294, %s705_s16   ;;  %s705_s16 = sphi %s744_s16, %s21_s16   ;;  %s701_s15 = sphi %s742_s15, %s954_s15   ;;  %s697_s14 = sphi %s740_s14, %s953_s14   ;;  %s693_s13 = sphi %s738_s13, %s923_s13   ;;  %s689_s12 = sphi %s736_s12, %s952_s12   ;;  %s685_s11 = sphi %s734_s11, %s951_s11   ;;  %s681_s10 = sphi %s732_s10, %s950_s10   ;;  %s677_s9 = sphi %s730_s9, %s949_s9  }
   0xa   : > { %s33_s19 = sadd.s32 1, %s701_s15  ;;  %p674_p1 = scmp.ne.s32.totalorder %s693_s13, 0 }
   0xb   : > { %p35_p0 = scmp.ge.s32.totalorder %s33_s19, 2  ;;  %p54_p2 = scmp.eq.s32.totalorder %s705_s16, 0 }
   0xc   : > { %p59_p3 = scmp.ne.s32.totalorder %s693_s13, %s689_s12  ;;  %p60_p5 = scmp.eq.s32.totalorder %s422_s17, 0 }
   0xd   : > { %s956_s19 = smov (%p35_p0, %s33_s19), 0  ;;  %p776_p4 = por %p674_p1, %p54_p2 }
   0xe   : > { %p780_p6 = por %p60_p5, %p59_p3  ;;  %s101_s22 = ssub.s32 %s701_s15, %s956_s19 }
   0xf   : > { %p102_p7 = scmp.eq.s32.totalorder %s101_s22, 0  ;;  %s104_s23 = sadd.s32 1, %s685_s11 }
  0x10   : > { %s939_s21 = scalar_select %p780_p6, 1, 0 }
  0x11   : > { %s788_s24 = scalar_select %p102_p7, %s685_s11, %s104_s23  }
  0x12   : > { %p114_p8 = scmp.ne.s32.totalorder %s685_s11, %s681_s10  ;;  %p115_p9 = scmp.eq.s32.totalorder %s422_s17, 1 }
  0x13   : > { %p120_p10 = scmp.ne.s32.totalorder %s681_s10, %s677_s9  ;;  %p121_p11 = scmp.eq.s32.totalorder %s423_s18, 1 }
  0x14   : > { %p794_p12 = por %p115_p9, %p114_p8  ;;  %p465_p1 = scmp.lt.s32.totalorder %s705_s16, 2 }
  0x15   : > { %p799_p0 = por %p121_p11, %p120_p10  ;;  %s707_s27 = smov [#allocation4]  }
  0x16   : > { %s940_s25 = scalar_select %p794_p12, 1, 0 }
  0x17   : > { %s941_s26 = scalar_select %p799_p0, 1, 0 }
  0x18   : > { %s155_s28 = sshll.u32 %s707_s27, 4  ;;  %p806_p2 = pnand %p465_p1, %p776_p4  ;;  %s156_s28 = int_to_ptr.vmem [resolvable:$true] %s155_s28 }
  0x19   : > { %s544_s4 = scalar_lea.hbm %s933_s0, 256 }
  0x1a   : > { %p545_p3 = scmp.ne.s32.totalorder %s933_s0, %s544_s4  ;;  %p546_p5 = pneg %p806_p2 }
  0x1b   : > { %p551_p8 = scmp.lt.s32.totalorder %s544_s4, %s544_s4 }
  0x1c   : > { %p547_p7 = pnand %p546_p5, %p545_p3 }
  0x1e   : > { %p548_p4 = pneg %p547_p7 }
  0x20   : > { %p553_p9 = pnand %p551_p8, %p548_p4 }
  0x22   : > { %556 = shalt.err (!%p553_p9)
}
  0x23   : > { %s557_s7 = scalar_lea.vmem %s156_s28, 256  ;;  %s564_s8 = scalar_lea.vmem %s156_s28, 512 }
  0x24   : > { %p558_p10 = scmp.ne.s32.totalorder %s156_s28, %s557_s7  ;;  %p565_p13 = scmp.lt.s32.totalorder %s156_s28, %s156_s28 }
  0x25   : > { %p566_p0 = scmp.lt.s32.totalorder %s564_s8, %s557_s7 }
  0x26   : > { %p560_p11 = pnand %p558_p10, %p546_p5 }
  0x27   : > { %p567_p12 = por %p566_p0, %p565_p13 }
  0x28   : > { %p561_p1 = pneg %p560_p11 }
  0x2a   : > { %p568_p6 = pnand %p567_p12, %p561_p1 }
  0x2c   : > { %571 = shalt.err (!%p568_p6)
}
  0x2d   : > { %s708_s12 = smov 128   ;;  %s709_s17 = smov 8  }
  0x2e   : > { %457 = dma.hbm_to_vmem [thread:$0]  (!%p806_p2), %s933_s0, 256, %s156_s28, [#allocation5], %s708_s12, %s708_s12, %s709_s17  }
  0x2f   : > { %p432_p3 = scmp.ge.s32.totalorder %s705_s16, 1  ;;  %p187_p7 = scmp.lt.s32.totalorder %s705_s16, 3 }
  0x30   : > { %s710_s23 = smov [#allocation7]   ;;  %s572_s4 = scalar_lea.hbm %s934_s1, 256 }
  0x31   : > { %p831_p4 = pnand %p432_p3, %p187_p7  ;;  %s179_s27 = sshll.u32 %s710_s23, 4  ;;  %s180_s27 = int_to_ptr.vmem [resolvable:$true] %s179_s27 }
  0x32   : > { %p573_p6 = scmp.ne.s32.totalorder %s934_s1, %s572_s4  ;;  %p579_p0 = scmp.lt.s32.totalorder %s572_s4, %s572_s4 }
  0x33   : > { %s943_s22 = scalar_select %p831_p4, 1, 0 }
  0x34   : > { %p575_p12 = pnand %p573_p6, %p546_p5 }
  0x36   : > { %p576_p13 = pneg %p575_p12 }
  0x38   : > { %p581_p8 = pnand %p579_p0, %p576_p13 }
  0x3a   : > { %584 = shalt.err (!%p581_p8)
}
  0x3b   : > { %s585_s28 = scalar_lea.vmem %s180_s27, 256  ;;  %s592_s7 = scalar_lea.vmem %s180_s27, 512 }
  0x3c   : > { %p586_p9 = scmp.ne.s32.totalorder %s180_s27, %s585_s28  ;;  %p593_p1 = scmp.lt.s32.totalorder %s180_s27, %s180_s27 }
  0x3d   : > { %p594_p3 = scmp.lt.s32.totalorder %s592_s7, %s585_s28 }
  0x3e   : > { %p588_p10 = pnand %p586_p9, %p546_p5 }
  0x3f   : > { %p595_p7 = por %p594_p3, %p593_p1 }
  0x40   : > { %p589_p11 = pneg %p588_p10 }
  0x42   : > { %p596_p4 = pnand %p595_p7, %p589_p11 }
  0x44   : > { %599 = shalt.err (!%p596_p4)
}
  0x45   : > { %460 = dma.hbm_to_vmem [thread:$0]  (!%p806_p2), %s934_s1, 256, %s180_s27, [#allocation8], %s708_s12, %s708_s12, %s709_s17  }
  0x46   : > { %p944_p6 = scmp.ne.s32.totalorder %s943_s22, 0 }
  0x47   : > { %s193_s20 = sand.u32 (!%p944_p6), 1, %s693_s13   ;;  %p945_p5 = scmp.ne.s32.totalorder (!%p944_p6), %s939_s21, 0 }
  0x48   : > { %191 = sbr.rel (%p944_p6) target bundleno = 143 (0x8f), region = 28  ;;  %s433_s23 = sshll.u32 (!%p944_p6), %s193_s20, 4 }
  0x49   : > { %s194_s30 = scalar_lea.sflag (!%p944_p6), [#allocation5], %s193_s20  ;;  %s197_s3 = scalar_lea.vmem (!%p944_p6), [#allocation4], %s433_s23 }
  0x4d   : > { %663 = dma.done.wait (%p945_p5), %s194_s30, 256  }
  0x4e   : > { %665 = vsyncadd (%p945_p5), %s194_s30, 4294967040  ;;  %s203_s29 = scalar_lea.sflag [#allocation8], %s193_s20  ;;  %s206_s4 = scalar_lea.vmem [#allocation7], %s433_s23 }
  0x4f   : > { %667 = dma.done.wait (%p945_p5), %s203_s29, 256  }
  0x50   : > { %669 = vsyncadd (%p945_p5), %s203_s29, 4294967040  ;;  %s229_s12 = sand.u32 1, %s681_s10   ;;  %s436_s17 = sshll.u32 %s697_s14, 4  ;;  %v711_v0 = vmov 0.0   ;;  %v248_v1 = vld [vmem:[%s197_s3] sm:$0xff]  ;;  %v249_v2 = vld [vmem:[%s197_s3 + $0x8] sm:$0xff] }
  0x51   : > { %s435_s22 = sshll.u32 %s229_s12, 4  ;;  %244 = vst [vmem:[#allocation2] sm:$0xff] %v711_v0  ;;  %245 = vst [vmem:[#allocation3] sm:$0xff] %v711_v0  ;;  %s252_s27 = sadd.s32 16, %s436_s17  ;;  %v250_v3 = vld [vmem:[%s206_s4] sm:$0xff]  ;;  %v251_v4 = vld [vmem:[%s206_s4 + $0x8] sm:$0xff] }
  0x52   : > { %s867_s5 = scalar_lea.vmem [#allocation9], %s435_s22  ;;  %p437_p2 = scmp.gt.s32.totalorder %s252_s27, 16 }
  0x54   : > { %257 = sbr.rel (%p437_p2) target bundleno = 96 (0x60), region = 44 }
  0x59   : > { %v259_v5 = vmul.f32 %v250_v3, %v248_v1  ;;  %v260_v6 = vmul.f32 %v251_v4, %v249_v2  ;;  %v265_v7 = vadd.f32 %v250_v3, %v248_v1  ;;  %v266_v8 = vadd.f32 %v251_v4, %v249_v2  ;;  %v258_v9 = vld [vmem:[#allocation2] sm:$0xff]  ;;  %v264_v10 = vld [vmem:[#allocation3] sm:$0xff] }
  0x5b   : > { %v261_v11 = vadd.f32 %v260_v6, %v259_v5  ;;  %v267_v12 = vadd.f32 %v266_v8, %v265_v7 }
  0x5d   : > { %v262_v13 = vadd.f32 %v261_v11, %v258_v9  ;;  %v268_v14 = vadd.f32 %v267_v12, %v264_v10 }
  0x5f   : > { %263 = vst [vmem:[#allocation2] sm:$0xff] %v262_v13  ;;  %269 = vst [vmem:[#allocation3] sm:$0xff] %v268_v14 }
  0x60 PF: > { %p438_p4 = scmp.le.s32.totalorder %s252_s27, 16 }
  0x61   : > { %s276_s21 = ssub.s32 (!%p438_p4), 16, %s436_s17 }
  0x62   : > { %272 = sbr.rel (%p438_p4) target bundleno = 118 (0x76), region = 48 }
  0x67   : > { %v273_v15 = vlaneseq  ;;  %v277_v16 = vstv %s276_s21  ;;  %v284_v27 = vld [vmem:[#allocation2] sm:$0xff]  ;;  %v290_v28 = vld [vmem:[#allocation3] sm:$0xff] }
  0x69   : > { %v274_v17 = vshrl.u32 %v273_v15, 7 }
  0x6b   : > { %v275_v18 = vadd.s32 8, %v274_v17  ;;  %vm278_vm0 = vcmp.lt.s32.totalorder %v274_v17, %v277_v16 }
  0x6c   : > { %v280_v19 = vsel %vm278_vm0, %v248_v1, 0.0  ;;  %v282_v20 = vsel %vm278_vm0, %v250_v3, 0.0 }
  0x6d   : > { %vm279_vm1 = vcmp.lt.s32.totalorder %v275_v18, %v277_v16  ;;  %v285_v21 = vmul.f32 %v282_v20, %v280_v19  ;;  %v291_v22 = vadd.f32 %v282_v20, %v280_v19 }
  0x6e   : > { %v281_v23 = vsel %vm279_vm1, %v249_v2, 0.0  ;;  %v283_v24 = vsel %vm279_vm1, %v251_v4, 0.0 }
  0x6f   : > { %v286_v25 = vmul.f32 %v283_v24, %v281_v23  ;;  %v292_v26 = vadd.f32 %v283_v24, %v281_v23 }
  0x71   : > { %v287_v29 = vadd.f32 %v286_v25, %v285_v21  ;;  %v293_v30 = vadd.f32 %v292_v26, %v291_v22 }
  0x73   : > { %v288_v31 = vadd.f32 %v287_v29, %v284_v27  ;;  %v294_v32 = vadd.f32 %v293_v30, %v290_v28 }
  0x75   : > { %289 = vst [vmem:[#allocation2] sm:$0xff] %v288_v31  ;;  %295 = vst [vmem:[#allocation3] sm:$0xff] %v294_v32 }
  0x76 PF: > { %s447_s6 = sshll.u32 %s697_s14, 8  ;;  %s318_s18 = sshll.u32 %s867_s5, 4  ;;  %s878_s18 = int_to_ptr.vmem [resolvable:$true] %s318_s18 }
  0x77   : > { %s875_s8 = scalar_lea.hbm %s935_s2, %s447_s6  ;;  %s882_s20 = scalar_lea.sflag [#allocation6], %s229_s12 }
  0x78   : > { %s600_s23 = scalar_lea.vmem %s878_s18, 256  ;;  %p946_p13 = scmp.ne.s32.totalorder %s940_s25, 0 }
  0x79   : > { %p601_p12 = scmp.ne.s32.totalorder %s878_s18, %s600_s23  ;;  %s712_s14 = smov [#allocation9]  }
  0x7a   : > { %s604_s30 = sshll.u32 %s712_s14, 4  ;;  %s605_s30 = int_to_ptr.vmem [resolvable:$false] %s604_s30 }
  0x7b   : > { %p602_p0 = pnand %p601_p12, %p946_p13  ;;  %s606_s3 = scalar_lea.vmem %s605_s30, 512 }
  0x7c   : > { %v299_v33 = vld [vmem:[#allocation2] sm:$0xff]  ;;  %v301_v34 = vld [vmem:[#allocation3] sm:$0xff]  ;;  %p607_p9 = scmp.lt.s32.totalorder %s878_s18, %s605_s30  ;;  %p608_p10 = scmp.lt.s32.totalorder %s606_s3, %s600_s23 }
  0x7d   : > { %300 = vst [vmem:[%s867_s5] sm:$0xff] %v299_v33  ;;  %439 = vst [vmem:[%s867_s5 + $0x8] sm:$0xff] %v301_v34  ;;  %p603_p8 = pneg %p602_p0 }
  0x7e   : > { %p609_p11 = por %p608_p10, %p607_p9 }
  0x80   : > { %p610_p1 = pnand %p609_p11, %p603_p8 }
  0x82   : > { %613 = shalt.err (!%p610_p1)
}
  0x83   : > { %s614_s29 = scalar_lea.hbm %s875_s8, 256  ;;  %s618_s17 = scalar_lea.hbm %s935_s2, 512 }
  0x84   : > { %p615_p3 = scmp.ne.s32.totalorder %s875_s8, %s614_s29  ;;  %p619_p5 = scmp.lt.s32.totalorder %s875_s8, %s935_s2 }
  0x85   : > { %p620_p2 = scmp.lt.s32.totalorder %s618_s17, %s614_s29 }
  0x86   : > { %p616_p7 = pnand %p615_p3, %p946_p13 }
  0x87   : > { %p621_p4 = por %p620_p2, %p619_p5 }
  0x88   : > { %p617_p6 = pneg %p616_p7 }
  0x8a   : > { %p622_p12 = pnand %p621_p4, %p617_p6 }
  0x8c   : > { %625 = shalt.err (!%p622_p12)
}
  0x8d   : > { %s713_s5 = smov 128   ;;  %s714_s21 = smov 8  }
  0x8e   : > { %452 = dma.vmem_to_hbm [thread:$0]  (%p946_p13), %s878_s18, 256, %s875_s8, %s882_s20, %s713_s5, %s713_s5, %s714_s21  }
  0x8f PF: > { %s333_s6 = sand.u32 1, %s677_s9   ;;  %p947_p0 = scmp.ne.s32.totalorder %s941_s26, 0 }
  0x90   : > { %p948_p8 = scmp.ge.s32.totalorder %s705_s16, 2  ;;  %s334_s28 = scalar_lea.sflag [#allocation6], %s333_s6 }
  0x92   : > { %p462_p9 = pnand %p948_p8, %p947_p0 }
  0x94   : > { %p463_p10 = pneg %p462_p9 }
  0x96   : > { %671 = dma.done.wait (%p463_p10), %s334_s28, 256  }
  0x97   : > { %673 = vsyncadd (%p463_p10), %s334_s28, 4294967040  ;;  %s21_s16 = sadd.s32 1, %s705_s16   ;;  %s949_s9 = smov %s681_s10 }
  0x98   : > { %p18_p11 = scmp.ge.s32.totalorder %s21_s16, 4   ;;  %s950_s10 = smov %s685_s11 }
  0x99   : > { %s951_s11 = smov %s788_s24  ;;  %s952_s12 = smov %s693_s13 }
  0x9a   : > { %s923_s13 = smov 0   ;;  %s953_s14 = smov %s701_s15 }
  0x9b   : > { %s954_s15 = smov %s956_s19  ;;  %20 = sbr.rel (!%p18_p11) target bundleno = 9 (0x9), region = 103 }
  0xa0   :  { %339 = vsyncpa [#allocation5], 1 }
  0xa1   :  { %341 = vsyncpa [#allocation5 + $0x1], 1 }
  0xa2   :  { %342 = vsyncpa [#allocation8], 1 }
  0xa3   :  { %344 = vsyncpa [#allocation8 + $0x1], 1 }
  0xa4   :  { %345 = vsyncpa [#allocation6], 1 }
  0xa5   :  { %347 = vsyncpa [#allocation6 + $0x1], 1 }

</bundles_post_ra>
